<compile_context>
chip_gen: v7x
topology: tpu7x:2x2x1
jax: 0.10.0
libtpu: 0.0.40
codegen_flags: <defaults>
</compile_context>

<pallas_src>
import functools

import jax
import jax.numpy as jnp
from jax import lax
from jax.experimental import pallas as pl
from jax.experimental.pallas import tpu as pltpu


def _unc_triplet_kernel(x_ref, tp_ref, loss_ref, *, normalize_feature: bool):
    x = x_ref[...]
    if x.dtype != jnp.float32:            # single cast, only if needed
        x = x.astype(jnp.float32)
    N, D = x.shape

    # ---- normalize() (optional) ----------------------------------------
    if normalize_feature:
        nrm = jnp.sqrt(jnp.sum(x * x, axis=-1, keepdims=True))
        x = x / (nrm + 1e-12)

    # ---- pdist_torch(inputs, inputs) ------------------------------------
    # gram = x @ x.T on the MXU (NT contraction, no transpose materialized).
    gram = lax.dot_general(x, x, (((1,), (1,)), ((), ())),
                           preferred_element_type=jnp.float32)        # (N, N)
    sq_col = jnp.sum(x * x, axis=-1, keepdims=True)                   # (N, 1)
    # Row orientation of the squared norms via a K=1 NT dot with ones(1,1)
    # (an MXU "transpose"), instead of a second (1,D)x(N,D) matmul.
    ones11 = jnp.ones((1, 1), jnp.float32)
    sq_row = lax.dot_general(ones11, sq_col, (((1,), (1,)), ((), ())),
                             preferred_element_type=jnp.float32)      # (1, N)
    dist2 = sq_col + sq_row - 2.0 * gram
    mat_dist = jnp.sqrt(jnp.maximum(dist2, 1e-12))                    # (N, N)

    # ---- targets / prob in both orientations from ONE packed buffer -----
    tp_col = tp_ref[...]                                              # (N, 2)
    eye2 = (lax.broadcasted_iota(jnp.int32, (2, 2), 0) ==
            lax.broadcasted_iota(jnp.int32, (2, 2), 1)).astype(jnp.float32)
    # tp_row = eye2 @ tp_col.T  (NT dot, K=2) -> (2, N); uses the otherwise
    # idle MXU instead of a standalone vector transpose.
    tp_row = lax.dot_general(eye2, tp_col, (((1,), (1,)), ((), ())),
                             preferred_element_type=jnp.float32)      # (2, N)
    t_row = tp_row[0:1, :]                                            # (1, N)
    p_row = tp_row[1:2, :]                                            # (1, N)
    t_col = tp_col[:, 0:1]                                            # (N, 1)
    p_col = tp_col[:, 1:2]                                            # (N, 1)

    # ---- similarity matrix ----------------------------------------------
    mat_sim = (t_col == t_row).astype(jnp.float32)                    # (N, N)

    # ---- _batch_hard: reference literally uses dist + (1 - sim) / dist + sim
    dp_mat = mat_dist + (1.0 - mat_sim)
    dn_mat = mat_dist + mat_sim
    hard_p = jnp.max(dp_mat, axis=1, keepdims=True)                   # dist_ap
    hard_n = jnp.min(dn_mat, axis=1, keepdims=True)                   # dist_an

    # ---- gather prob[ap_idx] / prob[an_idx] via the hard-mining mask -----
    # (ties: sums over tied columns; reference tie order is unspecified.)
    p_ap = jnp.sum(jnp.where(dp_mat == hard_p, p_row, 0.0),
                   axis=1, keepdims=True)
    p_an = jnp.sum(jnp.where(dn_mat == hard_n, p_row, 0.0),
                   axis=1, keepdims=True)
    uncer_ap = (p_ap + p_col) * 0.5
    uncer_an = (p_an + p_col) * 0.5

    # ---- log_softmax over the (ap, an) pair ------------------------------
    m = jnp.maximum(hard_p, hard_n)
    lse = m + jnp.log(jnp.exp(hard_p - m) + jnp.exp(hard_n - m))
    log_ap = hard_p - lse
    log_an = hard_n - lse

    # ---- loss = (-uncer * triple_dist).mean(0).sum() / 10 ----------------
    # TODO(synk): the reference forward print()s and exit(1)s before this
    # line; we implement the intended loss computation instead of terminating.
    total = jnp.sum(uncer_ap * log_ap + uncer_an * log_an)
    loss_ref[0, 0] = -total / jnp.float32(N * 10)


@functools.partial(jax.jit, static_argnames="normalize_feature")
def unc_triplet_loss(inputs, targets, prob, normalize_feature=False):
    """inputs: (N, D) float, targets: (N,) int, prob: (N,) float.

    label_assign / true_targets / threshold / alpha / epoch are unused by the
    reference forward's computed path, so they are not kernel inputs.
    """
    N, D = inputs.shape
    # Single packed side buffer: column 0 = targets (exact in f32), col 1 = prob.
    tp = jnp.stack([targets.astype(jnp.float32),
                    prob.astype(jnp.float32)], axis=1)                # (N, 2)

    kernel = functools.partial(_unc_triplet_kernel,
                               normalize_feature=normalize_feature)

    cost = pl.CostEstimate(
        flops=2 * N * N * D + 12 * N * N,          # gram + elementwise (N,N) work
        transcendentals=N * N + 6 * N,             # sqrt / exp / log
        bytes_accessed=inputs.dtype.itemsize * N * D + 4 * (2 * N + 1),
    )

    loss = pl.pallas_call(
        kernel,
        out_shape=jax.ShapeDtypeStruct((1, 1), jnp.float32),
        # No grid: a 1-step grid would be pure pipeline bookkeeping here.
        in_specs=[
            pl.BlockSpec(memory_space=pltpu.MemorySpace.VMEM),
            pl.BlockSpec(memory_space=pltpu.MemorySpace.VMEM),
        ],
        out_specs=pl.BlockSpec(memory_space=pltpu.MemorySpace.SMEM),
        cost_estimate=cost,
    )(inputs, tp)

    # Module returns (loss, tensor(0), tensor(0)).
    return loss[0, 0], jnp.array(0), jnp.array(0)


if __name__ == "__main__":
    key = jax.random.PRNGKey(0)
    k_x, k_t, k_p = jax.random.split(key, 3)

    N, D = 8, 32                                   # batch=8, hidden=32
    inputs = jax.random.normal(k_x, (N, D), dtype=jnp.float32)
    targets = jax.random.randint(k_t, (N,), 0, 4, dtype=jnp.int32)
    prob = jax.random.uniform(k_p, (N,), dtype=jnp.float32)

    loss, z0, z1 = unc_triplet_loss(inputs, targets, prob,
                                    normalize_feature=False)
    jax.block_until_ready(loss)
    print("KERNEL_OK")
</pallas_src>

<mosaic_0001>
module attributes {stable_mosaic.version = 11 : i64} {
  func.func @_unc_triplet_kernel(%arg0: memref<8x32xf32, #tpu.memory_space<vmem>>, %arg1: memref<8x2xf32, #tpu.memory_space<vmem>>, %arg2: memref<1x1xf32, #tpu.memory_space<smem>>) attributes {dimension_semantics = [], scalar_prefetch = 0 : i64, scratch_operands = 0 : i64, tpu.core_type = #tpu.core_type<tc>} {
    %c0 = arith.constant 0 : index
    %c0_0 = arith.constant 0 : index
    %0 = vector.load %arg0[%c0, %c0_0] : memref<8x32xf32, #tpu.memory_space<vmem>>, vector<8x32xf32>
    %cst = arith.constant dense<0.000000e+00> : vector<8x8xf32>
    %1 = tpu.matmul %0, %0, %cst {dimension_numbers = #tpu.dot_dimension_numbers<[1], [1], [0], [0], [0, 0, 1, 0], [], []>} : vector<8x32xf32>, vector<8x32xf32>, vector<8x8xf32> -> vector<8x8xf32>
    %2 = arith.mulf %0, %0 : vector<8x32xf32>
    %cst_1 = arith.constant dense<0.000000e+00> : vector<8xf32>
    %3 = vector.multi_reduction <add>, %2, %cst_1 [1] : vector<8x32xf32> to vector<8xf32>
    %4 = vector.shape_cast %3 : vector<8xf32> to vector<8x1xf32>
    %cst_2 = arith.constant 1.000000e+00 : f32
    %5 = vector.broadcast %cst_2 : f32 to vector<1x1xf32>
    %cst_3 = arith.constant dense<0.000000e+00> : vector<1x8xf32>
    %6 = tpu.matmul %5, %4, %cst_3 {dimension_numbers = #tpu.dot_dimension_numbers<[1], [1], [0], [0], [0, 0, 1, 0], [], []>} : vector<1x1xf32>, vector<8x1xf32>, vector<1x8xf32> -> vector<1x8xf32>
    %7 = vector.broadcast %4 : vector<8x1xf32> to vector<8x8xf32>
    %8 = vector.broadcast %6 : vector<1x8xf32> to vector<8x8xf32>
    %9 = arith.addf %7, %8 : vector<8x8xf32>
    %cst_4 = arith.constant 2.000000e+00 : f32
    %10 = vector.broadcast %cst_4 : f32 to vector<8x8xf32>
    %11 = arith.mulf %10, %1 : vector<8x8xf32>
    %12 = arith.subf %9, %11 : vector<8x8xf32>
    %cst_5 = arith.constant 9.99999996E-13 : f32
    %13 = vector.broadcast %cst_5 : f32 to vector<8x8xf32>
    %14 = arith.maximumf %12, %13 : vector<8x8xf32>
    %15 = math.sqrt %14 : vector<8x8xf32>
    %c0_6 = arith.constant 0 : index
    %c0_7 = arith.constant 0 : index
    %16 = vector.load %arg1[%c0_6, %c0_7] : memref<8x2xf32, #tpu.memory_space<vmem>>, vector<8x2xf32>
    %17 = tpu.iota {dimensions = array<i32: 0>} : vector<2x2xi32>
    %18 = tpu.iota {dimensions = array<i32: 1>} : vector<2x2xi32>
    %19 = arith.cmpi eq, %17, %18 : vector<2x2xi32>
    %20 = arith.extui %19 : vector<2x2xi1> to vector<2x2xi32>
    %21 = arith.sitofp %20 : vector<2x2xi32> to vector<2x2xf32>
    %cst_8 = arith.constant dense<0.000000e+00> : vector<2x8xf32>
    %22 = tpu.matmul %21, %16, %cst_8 {dimension_numbers = #tpu.dot_dimension_numbers<[1], [1], [0], [0], [0, 0, 1, 0], [], []>} : vector<2x2xf32>, vector<8x2xf32>, vector<2x8xf32> -> vector<2x8xf32>
    %23 = vector.extract_strided_slice %22 {offsets = [0, 0], sizes = [1, 8], strides = [1, 1]} : vector<2x8xf32> to vector<1x8xf32>
    %24 = vector.extract_strided_slice %22 {offsets = [1, 0], sizes = [1, 8], strides = [1, 1]} : vector<2x8xf32> to vector<1x8xf32>
    %25 = vector.extract_strided_slice %16 {offsets = [0, 0], sizes = [8, 1], strides = [1, 1]} : vector<8x2xf32> to vector<8x1xf32>
    %26 = vector.extract_strided_slice %16 {offsets = [0, 1], sizes = [8, 1], strides = [1, 1]} : vector<8x2xf32> to vector<8x1xf32>
    %27 = vector.broadcast %25 : vector<8x1xf32> to vector<8x8xf32>
    %28 = vector.broadcast %23 : vector<1x8xf32> to vector<8x8xf32>
    %29 = arith.cmpf oeq, %27, %28 : vector<8x8xf32>
    %30 = arith.extui %29 : vector<8x8xi1> to vector<8x8xi32>
    %31 = arith.sitofp %30 : vector<8x8xi32> to vector<8x8xf32>
    %cst_9 = arith.constant 1.000000e+00 : f32
    %32 = vector.broadcast %cst_9 : f32 to vector<8x8xf32>
    %33 = arith.subf %32, %31 : vector<8x8xf32>
    %34 = arith.addf %15, %33 : vector<8x8xf32>
    %35 = arith.addf %15, %31 : vector<8x8xf32>
    %cst_10 = arith.constant dense<0xFF800000> : vector<8xf32>
    %36 = vector.multi_reduction <maximumf>, %34, %cst_10 [1] : vector<8x8xf32> to vector<8xf32>
    %37 = vector.shape_cast %36 : vector<8xf32> to vector<8x1xf32>
    %cst_11 = arith.constant dense<0x7F800000> : vector<8xf32>
    %38 = vector.multi_reduction <minimumf>, %35, %cst_11 [1] : vector<8x8xf32> to vector<8xf32>
    %39 = vector.shape_cast %38 : vector<8xf32> to vector<8x1xf32>
    %40 = vector.broadcast %37 : vector<8x1xf32> to vector<8x8xf32>
    %41 = arith.cmpf oeq, %34, %40 : vector<8x8xf32>
    %cst_12 = arith.constant 0.000000e+00 : f32
    %42 = vector.shape_cast %24 : vector<1x8xf32> to vector<1x8xf32>
    %43 = vector.broadcast %42 : vector<1x8xf32> to vector<8x8xf32>
    %44 = vector.broadcast %cst_12 : f32 to vector<8x8xf32>
    %45 = arith.select %41, %43, %44 : vector<8x8xi1>, vector<8x8xf32>
    %cst_13 = arith.constant dense<0.000000e+00> : vector<8xf32>
    %46 = vector.multi_reduction <add>, %45, %cst_13 [1] : vector<8x8xf32> to vector<8xf32>
    %47 = vector.shape_cast %46 : vector<8xf32> to vector<8x1xf32>
    %48 = vector.broadcast %39 : vector<8x1xf32> to vector<8x8xf32>
    %49 = arith.cmpf oeq, %35, %48 : vector<8x8xf32>
    %cst_14 = arith.constant 0.000000e+00 : f32
    %50 = vector.shape_cast %24 : vector<1x8xf32> to vector<1x8xf32>
    %51 = vector.broadcast %50 : vector<1x8xf32> to vector<8x8xf32>
    %52 = vector.broadcast %cst_14 : f32 to vector<8x8xf32>
    %53 = arith.select %49, %51, %52 : vector<8x8xi1>, vector<8x8xf32>
    %cst_15 = arith.constant dense<0.000000e+00> : vector<8xf32>
    %54 = vector.multi_reduction <add>, %53, %cst_15 [1] : vector<8x8xf32> to vector<8xf32>
    %55 = vector.shape_cast %54 : vector<8xf32> to vector<8x1xf32>
    %56 = arith.addf %47, %26 : vector<8x1xf32>
    %cst_16 = arith.constant 5.000000e-01 : f32
    %57 = vector.broadcast %cst_16 : f32 to vector<8x1xf32>
    %58 = arith.mulf %56, %57 : vector<8x1xf32>
    %59 = arith.addf %55, %26 : vector<8x1xf32>
    %cst_17 = arith.constant 5.000000e-01 : f32
    %60 = vector.broadcast %cst_17 : f32 to vector<8x1xf32>
    %61 = arith.mulf %59, %60 : vector<8x1xf32>
    %62 = arith.maximumf %37, %39 : vector<8x1xf32>
    %63 = arith.subf %37, %62 : vector<8x1xf32>
    %64 = math.exp %63 : vector<8x1xf32>
    %65 = arith.subf %39, %62 : vector<8x1xf32>
    %66 = math.exp %65 : vector<8x1xf32>
    %67 = arith.addf %64, %66 : vector<8x1xf32>
    %68 = math.log %67 : vector<8x1xf32>
    %69 = arith.addf %62, %68 : vector<8x1xf32>
    %70 = arith.subf %37, %69 : vector<8x1xf32>
    %71 = arith.subf %39, %69 : vector<8x1xf32>
    %72 = arith.mulf %58, %70 : vector<8x1xf32>
    %73 = arith.mulf %61, %71 : vector<8x1xf32>
    %74 = arith.addf %72, %73 : vector<8x1xf32>
    %75 = vector.shape_cast %74 : vector<8x1xf32> to vector<1x8x1xf32>
    %cst_18 = arith.constant dense<0.000000e+00> : vector<1xf32>
    %76 = vector.multi_reduction <add>, %75, %cst_18 [1, 2] : vector<1x8x1xf32> to vector<1xf32>
    %77 = vector.shape_cast %76 : vector<1xf32> to vector<1x1x1xf32>
    %78 = vector.extract %77[0, 0, 0] : f32 from vector<1x1x1xf32>
    %cst_19 = arith.constant 0.000000e+00 : f32
    %79 = arith.subf %cst_19, %78 : f32
    %cst_20 = arith.constant 8.000000e+01 : f32
    %80 = arith.divf %79, %cst_20 : f32
    %c0_21 = arith.constant 0 : index
    %c0_22 = arith.constant 0 : index
    %81 = memref.load %arg2[%c0_21, %c0_22] : memref<1x1xf32, #tpu.memory_space<smem>>
    memref.store %80, %arg2[%c0_21, %c0_22] : memref<1x1xf32, #tpu.memory_space<smem>>
    return
  }
}

</mosaic_0001>

<bundles_post_ra>
// kernel: unc_triplet_loss.1
= control target key start
LH: loop header
LB: loop body
LE: loop exit
PB: predicated region body
PF: predicated region fallthrough
CT: control target
= control target key end

     0   :  { %vm13_vm0 = vcmask 261120   ;;  %s466_s0 = inlined_call_operand.vmem [shape: f32[8,32], index: 0, kind: input, shape index: {}]   ;;  %s467_s1 = inlined_call_operand.vmem [shape: f32[8,2], index: 1, kind: input, shape index: {}]   ;;  %s468_s2 = inlined_call_operand.hbm [shape: f32[1,1], index: 2, kind: output, shape index: {}]  }
   0x1   :  { %v12_v0 = vld [vmem:[%s466_s0] sm:$0xff] }
   0x2   :  { %7 = vsyncpa [#allocation3], 0  ;;  %v87_v1 = vmul.f32 %v12_v0, %v12_v0  ;;  %v414_v2 = vmov 0.0   ;;  %vm415_vm1 = vmmov 0   ;;  %v441_v4 = vld [vmem:[%s467_s1] sm:$0xff]  ;;  %vm191_vm2 = vcmask 15360  }
   0x3   :  { %375 = vmatprep.subr.mxu1 %v414_v2  ;;  %370 = vmatprep.subr.mxu0 %v414_v2  ;;  %v168_v5 = vlaneseq  ;;  %v416_v6 = vmov 0   ;;  %vm91_vm4 = vcmask 7168   ;;  %v417_v11 = vmov 1.0   ;;  %s418_s0 = smov 127   ;;  %s402_s17 = scalar_lea.hbm %s468_s2, 16 }
   0x4   :  { %371 = vmatpush3.xpose.msk.msra.mxu0 %vm13_vm0, %v12_v0  ;;  %v88_v3 = vsel %vm13_vm0, %v87_v1, 0.0  ;;  %377 = vmatprep.mubr.msk.f32.mxu1 %vm415_vm1, %v414_v2  ;;  %vm282_vm8 = vcmask 64512   ;;  %p403_p0 = scmp.ne.s32.totalorder %s468_s2, %s402_s17  ;;  %p406_p1 = scmp.lt.u32.totalorder %s402_s17, %s468_s2 }
   0x5   :  { %380 = vmatprep.subr.mxu0 %v414_v2  ;;  %89 = vadd.xlane.f32.xlu0 %v88_v3  ;;  %v169_v7 = vshrl.u32 %v168_v5, 7  ;;  %v187_v8 = vand.u32 127, %v168_v5 }
   0x6   :  { %372 = vmatprep.mubr.msk.f32.mxu0 %vm415_vm1, %v414_v2  ;;  %393 = vset.pattern.permute.xlu0 %v416_v6  ;;  %p408_p2 = pnand %p406_p1, %p403_p0 }
   0x7   :  { %373 = vmatmul.mubr.msk.f32.vlgmr.msra.gmra.mrb[0].mxu0 %vm13_vm0, %v12_v0  ;;  %vm188_vm3 = vcmp.eq.s32.totalorder %v169_v7, %v187_v8  ;;  %v170_v16 = vsub.s32 0, %v169_v7  ;;  %v292_v37 = vsub.s32 1, %v169_v7 }
   0x8   :  { %382 = vmatprep.mubr.msk.f32.mxu0 %vm415_vm1, %v414_v2  ;;  %381 = vmatpush3.xpose.msk.msra.mxu0 %vm191_vm2, %v441_v4  ;;  %v360_v9 = vsel %vm188_vm3, 1.0, %v414_v2 }
   0xb   :  { %383 = vmatmul.mubr.msk.f32.vlgmr.msra.gmra.mrb[2].mxu0 %vm191_vm2, %v360_v9 }
  0x1b   :  { %269 = vperm.xlu0 %393, %v441_v4  }
  0x92   :  { %v90_v10 = vpop.xlane.xlu0 %89 }
  0x93   :  { %376 = vmatpush3.xpose.msk.msra.mxu1 %vm91_vm4, %v90_v10 }
  0x96   :  { %378 = vmatmul.mubr.msk.f32.vlgmr.msra.gmra.mrb[0].mxu1 %vm91_vm4, %v417_v11 }
  0x9a   :  { %v270_v25 = vpop.permute.xlu0 %269 }
  0xda   :  { %v83_v12 = vpop.f32.mrb[0].mxu0 }
  0xdb   :  { %v374_v13 = vpop.f32.mrb[1].mxu0  ;;  %v173_v19 = vmul.f32 2.0, %v83_v12 }
  0xde   :  { %v264_v14 = vpop.f32.mrb[2].mxu0 }
  0xdf   :  { %v384_v15 = vpop.f32.mrb[3].mxu0  ;;  %v275_v24 = vrot.slane %v264_v14, %v170_v16  ;;  %v293_v38 = vrot.slane %v264_v14, %v292_v37 }
  0xe1   :  { %vm276_vm5 = vcmp.eq.f32.partialorder %v270_v25, %v275_v24 }
  0xe2   :  { %v363_v26 = vsel %vm276_vm5, 1.0, %v414_v2 }
  0xe3   :  { %v279_v28 = vsub.f32 1.0, %v363_v26 }
 0x169   :  { %v164_v17 = vpop.f32.mrb[0].mxu1 }
 0x16a   :  { %v171_v18 = vrot.slane %v164_v17, %v170_v16  ;;  %v379_v20 = vpop.f32.mrb[1].mxu1 }
 0x16c   :  { %v172_v21 = vadd.f32 %v171_v18, %v90_v10 }
 0x16e   :  { %v174_v22 = vsub.f32 %v172_v21, %v173_v19 }
 0x170   :  { %v175_v23 = vmax.f32 %v174_v22, 1e-12 }
 0x172   :  { %394 = vrsqrt.f32 %v175_v23  ;;  %vm178_vm6 = vcmp.eq.f32.partialorder %v175_v23, inf  ;;  %v181_v30 = vand.u32 2147483648, %v175_v23  ;;  %vm180_vm7 = vcmp.eq.f32.partialorder %v175_v23, 0.0 }
 0x17c   :  { %v395_v27 = vpop.eup %394 }
 0x17d   :  { %v177_v29 = vmul.f32 %v395_v27, %v175_v23 }
 0x17f   :  { %v179_v31 = vsel %vm178_vm6, %v175_v23, %v177_v29 }
 0x180   :  { %v182_v32 = vsel %vm180_vm7, %v181_v30, %v179_v31 }
 0x181   :  { %v280_v33 = vadd.f32 %v279_v28, %v182_v32  ;;  %v281_v34 = vadd.f32 %v363_v26, %v182_v32 }
 0x183   :  { %v283_v35 = vsel %vm282_vm8, %v280_v33, -inf  ;;  %v286_v36 = vsel %vm282_vm8, %v281_v34, inf }
 0x184   :  { %284 = vmax.xlane.f32.xlu1 %v283_v35 }
 0x188   :  { %287 = vmin.xlane.f32.xlu1 %v286_v36 }
 0x211   :  { %v285_v39 = vpop.xlane.xlu1 %284 }
 0x212   :  { %vm289_vm9 = vcmp.eq.f32.partialorder %v280_v33, %v285_v39 }
 0x213   :  { %v294_v40 = vsel %vm289_vm9, %v293_v38, 0.0 }
 0x214   :  { %v295_v41 = vsel %vm282_vm8, %v294_v40, 0.0 }
 0x215   :  { %296 = vadd.xlane.f32.xlu1 %v295_v41  ;;  %v288_v42 = vpop.xlane.xlu1 %287 }
 0x216   :  { %vm298_vm10 = vcmp.eq.f32.partialorder %v281_v34, %v288_v42  ;;  %v307_v45 = vmax.f32 %v285_v39, %v288_v42 }
 0x217   :  { %v299_v43 = vsel %vm298_vm10, %v293_v38, 0.0 }
 0x218   :  { %v300_v44 = vsel %vm282_vm8, %v299_v43, 0.0  ;;  %v308_v46 = vsub.f32 %v285_v39, %v307_v45  ;;  %v311_v47 = vsub.f32 %v288_v42, %v307_v45 }
 0x219   :  { %301 = vadd.xlane.f32.xlu1 %v300_v44 }
 0x21a   :  { %v309_v48 = vmul.f32 1.442695, %v308_v46  ;;  %v312_v49 = vmul.f32 1.442695, %v311_v47 }
 0x21c   :  { %396 = vpow2.f32 %v309_v48 }
 0x21d   :  { %398 = vpow2.f32 %v312_v49 }
 0x226   :  { %v397_v50 = vpop.eup %396 }
 0x227   :  { %v399_v51 = vpop.eup %398 }
 0x228   :  { %v314_v52 = vadd.f32 %v399_v51, %v397_v50 }
 0x22a   :  { %400 = vlog2.f32 %v314_v52 }
 0x234   :  { %v401_v53 = vpop.eup %400 }
 0x235   :  { %v316_v54 = vmul.f32 0.6931472, %v401_v53 }
 0x237   :  { %v317_v57 = vadd.f32 %v316_v54, %v307_v45 }
 0x239   :  { %v318_v61 = vsub.f32 %v285_v39, %v317_v57  ;;  %v319_v62 = vsub.f32 %v288_v42, %v317_v57 }
 0x2a2   :  { %v297_v55 = vpop.xlane.xlu1 %296 }
 0x2a3   :  { %v303_v56 = vadd.f32 %v297_v55, %v441_v4 }
 0x2a5   :  { %v304_v59 = vmul.f32 0.5, %v303_v56 }
 0x2a6   :  { %v302_v58 = vpop.xlane.xlu1 %301 }
 0x2a7   :  { %v305_v60 = vadd.f32 %v302_v58, %v441_v4  ;;  %v320_v0 = vmul.f32 %v318_v61, %v304_v59 }
 0x2a9   :  { %v306_v63 = vmul.f32 0.5, %v305_v60 }
 0x2ab   :  { %v321_v1 = vmul.f32 %v319_v62, %v306_v63 }
 0x2ad   :  { %v322_v2 = vadd.f32 %v321_v1, %v320_v0 }
 0x2af   :  { %324 = vrot.lane.b32.xlu1 %v322_v2, %s418_s0 }
 0x321   :  { %v325_v3 = vpop.permute.xlu1 %324 }
 0x322   :  { %v327_v5 = vsel %vm91_vm4, %v325_v3, 0.0 }
 0x323   :  { %328 = vadd.xlane.f32.xlu1 %v327_v5 }
 0x3b0   :  { %v329_v6 = vpop.xlane.xlu1 %328 }
 0x3b1   :  { %v330_v7 = vrot.slane %v329_v6, 4 }
 0x3b3   :  { %v331_v8 = vadd.f32 %v330_v7, %v329_v6 }
 0x3b5   :  { %v332_v9 = vrot.slane %v331_v8, 2 }
 0x3b7   :  { %v333_v10 = vadd.f32 %v332_v9, %v331_v8 }
 0x3b9   :  { %v334_v11 = vrot.slane %v333_v10, 1 }
 0x3bb   :  { %v335_v12 = vadd.f32 %v334_v11, %v333_v10 }
 0x3bd   :  { %385 = vpush %v335_v12 }
 0x3ee   :  { %s386_s1 = spop %385 }
 0x3ef   :  { %s337_s13 = ssub.f32 0.0, %s386_s1 }
 0x3f1   :  { %s340_s14 = smul.f32 0.0125, %s337_s13 }
 0x3f3   :  { %342 = sst [smem:[#allocation2]] %s340_s14 }
 0x3f4   :  { %411 = shalt.err (!%p408_p2)
}
 0x3f5   :  { %s419_s22 = smov [#allocation2]  }
 0x3f6   :  { %350 = dma.smem_to_hbm %s419_s22, 16, %s468_s2, [#allocation3]  }
 0x3f7   :  { %412 = dma.done.wait [#allocation3], 16  }
 0x3f8   :  { %413 = vsyncadd [#allocation3], 4294967280 }
 0x3f9   :  { %354 = sfence }
 0x3fa   :  { %355 = vsyncpa [#allocation3], 1 }

</bundles_post_ra>
